<compile_context>
chip_gen: v7x
topology: tpu7x:2x2x1
jax: 0.10.0
libtpu: 0.0.40
codegen_flags: <defaults>
</compile_context>

<pallas_src>
import functools

import jax
import jax.numpy as jnp
from jax.experimental import pallas as pl
from jax.experimental.pallas import tpu as pltpu


def _rope_kernel(q_ref, cos_ref, sin_ref, o_ref, *, num_heads):
    """RoPE on one (seq-tile, batch) block.

    q_ref   : (1, tq, num_heads, head_dim)   interleaved input channels
    cos_ref : (tq, head_dim)                 per-position table (repeat_interleave'd)
    sin_ref : (tq, head_dim)
    o_ref   : (1, num_heads, tq, head_dim)   head-major output
    """
    c = cos_ref[...].astype(jnp.float32)
    s = sin_ref[...].astype(jnp.float32)
    hd = c.shape[-1]

    # Lane-parity mask, hoisted out of the per-head loop (JAX does not CSE
    # broadcast/iota, so build it exactly once per kernel invocation).
    lane_is_even = (jax.lax.broadcasted_iota(jnp.int32, c.shape, 1) % 2) == 0

    # Static (unrolled) loop over heads: strided (tq, head_dim) loads from the
    # interleaved tile, contiguous per-head stores into the head-major output.
    for h in range(num_heads):
        x = q_ref[0, :, h, :].astype(jnp.float32)            # (tq, head_dim)

        # Pair swizzle: x_swap[2i] = -x[2i+1], x_swap[2i+1] = x[2i].
        # Static roll-by-1 lowers to a lane slice+concat; the wrap-around lanes
        # are never selected because head_dim is even.
        # TODO(synk): switch to pltpu.roll (XLU vrot fast path) once its
        # lowering/semantics for sub-128 head_dims is confirmed on all targets.
        nxt = jnp.roll(x, hd - 1, axis=1)                     # nxt[j] = x[(j+1) % hd]
        prv = jnp.roll(x, 1, axis=1)                          # prv[j] = x[(j-1) % hd]
        x_swap = jnp.where(lane_is_even, -nxt, prv)

        # r = q * cos_pos + q2 * sin_pos   (cache-name swap kept on purpose)
        o_ref[0, h, :, :] = (x * c + x_swap * s).astype(o_ref.dtype)


def make_rope_cache(d_model, num_heads, base=10000, max_len=512, dtype=jnp.float32):
    """One-time cache build (analogue of the module's _compute_pos_emb).

    Returns full-width (max_len, head_dim) tables with repeat_interleave(2)
    already applied, so the kernel multiplies them elementwise with q.
    NOTE: the module's cache *named* cos holds sin(pos*theta) and vice versa;
    reproduced exactly here.
    """
    head_dim = d_model // num_heads
    theta_i = 1.0 / base ** (
        jnp.arange(0, head_dim, 2, dtype=jnp.float32) / head_dim
    )
    positions = jnp.arange(max_len, dtype=jnp.float32)
    pos_emb = positions[:, None] * theta_i[None, :]           # (max_len, head_dim//2)
    cos_cache = jnp.repeat(jnp.sin(pos_emb), 2, axis=-1).astype(dtype)  # (max_len, head_dim)
    sin_cache = jnp.repeat(jnp.cos(pos_emb), 2, axis=-1).astype(dtype)
    return cos_cache, sin_cache


def _vmem_budget():
    """(per-block byte target, vmem_limit_bytes), generation-aware."""
    try:
        vmem_bytes = int(pltpu.get_tpu_info().vmem_capacity_bytes)
    except Exception:
        vmem_bytes = 64 * 1024 * 1024          # conservative: assume v7x-class VMEM
    if vmem_bytes >= 100 * 1024 * 1024:        # v5e / v6e: 128 MiB physical VMEM
        return 4 * 1024 * 1024, 64 * 1024 * 1024
    # v7x-class: 64 MiB physical VMEM -> smaller blocks, modest scoped limit.
    return 2 * 1024 * 1024, 40 * 1024 * 1024


def _pick_tq(q_len_pad, d_model, dtype_bytes, target_bytes):
    """Largest seq tile that divides q_len_pad, is a multiple of 8 (f32 sublane
    granule) and keeps one q block <= target_bytes.  Never drops below 8, so
    degenerate shapes still get a valid (tiny) block."""
    best = 8
    for cand in range(8, q_len_pad + 1, 8):
        if q_len_pad % cand == 0 and cand * d_model * dtype_bytes <= target_bytes:
            best = cand
    return best


def rotary_embedding(q, cos_cache, sin_cache, num_heads):
    """Forward pass: q (bs, q_len, d_model) -> (bs, num_heads, q_len, head_dim)."""
    bs, q_len, d_model = q.shape
    if d_model % num_heads != 0:
        raise ValueError("d_model must be divisible by num_heads")
    head_dim = d_model // num_heads
    if head_dim % 2 != 0:
        raise ValueError("head_dim must be even for RoPE")
    max_len = cos_cache.shape[0]
    if q_len > max_len:
        raise ValueError(f"q_len={q_len} exceeds max_len={max_len} of the RoPE cache")
    assert cos_cache.shape == (max_len, head_dim)
    assert sin_cache.shape == (max_len, head_dim)

    # Pad ragged sequence lengths up to the f32 sublane granule (8); pad rows
    # are sliced off after the kernel.
    q_len_pad = ((q_len + 7) // 8) * 8
    if q_len_pad != q_len:
        q = jnp.pad(q, ((0, 0), (0, q_len_pad - q_len), (0, 0)))
    if q_len_pad > max_len:  # only possible for ragged q_len near max_len
        extra = q_len_pad - max_len
        cos_cache = jnp.pad(cos_cache, ((0, extra), (0, 0)))
        sin_cache = jnp.pad(sin_cache, ((0, extra), (0, 0)))

    # Free metadata reshape — no data movement; heads stay contiguous in HBM.
    q4 = q.reshape(bs, q_len_pad, num_heads, head_dim)

    block_budget, vmem_limit = _vmem_budget()
    tq = _pick_tq(q_len_pad, d_model, q.dtype.itemsize, block_budget)
    n_qt = q_len_pad // tq

    # Seq tiles outermost, batch innermost: the cos/sin block index then only
    # changes n_qt times total, so the tables are fetched once per seq tile
    # rather than once per (batch, tile) step.
    grid = (n_qt, bs)
    if n_qt >= 2:
        semantics = ("parallel", "arbitrary")   # split seq tiles across TCs (v7x)
    else:
        semantics = ("arbitrary", "parallel")   # only one seq tile -> split batch

    kernel = functools.partial(_rope_kernel, num_heads=num_heads)

    out = pl.pallas_call(
        kernel,
        out_shape=jax.ShapeDtypeStruct((bs, num_heads, q_len_pad, head_dim), q.dtype),
        grid=grid,
        in_specs=[
            # q: one contiguous (tq, num_heads, head_dim) slab per (t, b).
            pl.BlockSpec((1, tq, num_heads, head_dim), lambda t, b: (b, t, 0, 0)),
            # cos/sin: depend only on the seq-tile axis -> resident across batch.
            pl.BlockSpec((tq, head_dim), lambda t, b: (t, 0)),
            pl.BlockSpec((tq, head_dim), lambda t, b: (t, 0)),
        ],
        out_specs=pl.BlockSpec(
            (1, num_heads, tq, head_dim), lambda t, b: (b, 0, t, 0)
        ),
        compiler_params=pltpu.CompilerParams(
            dimension_semantics=semantics,
            vmem_limit_bytes=vmem_limit,
        ),
    )(q4, cos_cache, sin_cache)

    if q_len_pad != q_len:
        out = out[:, :, :q_len, :]
    return out


def rotary_embedding_ref(q, num_heads, base=10000, max_len=512):
    """Pure-JAX transliteration of the PyTorch forward, for verification."""
    bs, q_len, d_model = q.shape
    head_dim = d_model // num_heads
    theta_i = 1.0 / base ** (
        jnp.arange(0, head_dim, 2, dtype=jnp.float32) / head_dim
    )
    positions = jnp.arange(max_len, dtype=jnp.float32)
    pos_emb = positions[:, None] * theta_i[None, :]
    cos_pos = jnp.repeat(jnp.sin(pos_emb), 2, axis=-1)[:q_len]
    sin_pos = jnp.repeat(jnp.cos(pos_emb), 2, axis=-1)[:q_len]
    qh = q.reshape(bs, q_len, num_heads, head_dim).transpose(0, 2, 1, 3)
    q2 = jnp.stack([-qh[..., 1::2], qh[..., ::2]], axis=-1).reshape(
        bs, num_heads, q_len, head_dim
    )
    return qh * cos_pos + q2 * sin_pos


if __name__ == "__main__":
    key = jax.random.PRNGKey(0)
    k1, k2 = jax.random.split(key)

    # --- Case 1: the module-sized small shapes (d_model=32, heads=4, head_dim=8)
    d_model, num_heads, max_len, bs, q_len = 32, 4, 512, 2, 8
    q = jax.random.normal(k1, (bs, q_len, d_model), dtype=jnp.float32)
    cos_c, sin_c = make_rope_cache(d_model, num_heads, base=10000, max_len=max_len)
    out = jax.block_until_ready(rotary_embedding(q, cos_c, sin_c, num_heads))
    ref = rotary_embedding_ref(q, num_heads, base=10000, max_len=max_len)
    assert out.shape == (bs, num_heads, q_len, d_model // num_heads), out.shape
    assert jnp.allclose(out, ref, atol=1e-5, rtol=1e-5), "case 1 mismatch vs reference"

    # --- Case 2: lane-aligned head_dim (=128) and a ragged q_len (pads 12 -> 16)
    d_model, num_heads, max_len, bs, q_len = 256, 2, 32, 2, 12
    q = jax.random.normal(k2, (bs, q_len, d_model), dtype=jnp.float32)
    cos_c, sin_c = make_rope_cache(d_model, num_heads, base=10000, max_len=max_len)
    out = jax.block_until_ready(rotary_embedding(q, cos_c, sin_c, num_heads))
    ref = rotary_embedding_ref(q, num_heads, base=10000, max_len=max_len)
    assert out.shape == (bs, num_heads, q_len, d_model // num_heads), out.shape
    assert jnp.allclose(out, ref, atol=1e-5, rtol=1e-5), "case 2 mismatch vs reference"

    print("KERNEL_OK")
</pallas_src>

<mosaic_0001>
module attributes {stable_mosaic.version = 11 : i64} {
  func.func @_rope_kernel(%arg0: i32, %arg1: i32, %arg2: memref<1x8x4x8xf32, #tpu.memory_space<vmem>>, %arg3: memref<8x8xf32, #tpu.memory_space<vmem>>, %arg4: memref<8x8xf32, #tpu.memory_space<vmem>>, %arg5: memref<1x4x8x8xf32, #tpu.memory_space<vmem>>) attributes {dimension_semantics = [#tpu.dimension_semantics<arbitrary>, #tpu.dimension_semantics<parallel>], iteration_bounds = array<i64: 1, 2>, scalar_prefetch = 0 : i64, scratch_operands = 0 : i64, tpu.core_type = #tpu.core_type<tc>, window_params = [{transform_indices = @transform_0, window_bounds = array<i64: 1, 8, 4, 8>}, {transform_indices = @transform_1, window_bounds = array<i64: 8, 8>}, {transform_indices = @transform_2, window_bounds = array<i64: 8, 8>}, {transform_indices = @transform_3, window_bounds = array<i64: 1, 4, 8, 8>}]} {
    %c0 = arith.constant 0 : index
    %c0_0 = arith.constant 0 : index
    %0 = vector.load %arg3[%c0, %c0_0] : memref<8x8xf32, #tpu.memory_space<vmem>>, vector<8x8xf32>
    %c0_1 = arith.constant 0 : index
    %c0_2 = arith.constant 0 : index
    %1 = vector.load %arg4[%c0_1, %c0_2] : memref<8x8xf32, #tpu.memory_space<vmem>>, vector<8x8xf32>
    %2 = tpu.iota {dimensions = array<i32: 1>} : vector<8x8xi32>
    %c2_i32 = arith.constant 2 : i32
    %c0_i32 = arith.constant 0 : i32
    %3 = arith.cmpi eq, %c2_i32, %c0_i32 : i32
    %c1_i32 = arith.constant 1 : i32
    %4 = arith.select %3, %c1_i32, %c2_i32 : i32
    %5 = vector.broadcast %4 : i32 to vector<8x8xi32>
    %6 = arith.remsi %2, %5 : vector<8x8xi32>
    %c0_i32_3 = arith.constant 0 : i32
    %7 = vector.broadcast %c0_i32_3 : i32 to vector<8x8xi32>
    %8 = arith.cmpi ne, %6, %7 : vector<8x8xi32>
    %c0_i32_4 = arith.constant 0 : i32
    %9 = vector.broadcast %c0_i32_4 : i32 to vector<8x8xi32>
    %10 = arith.cmpi slt, %6, %9 : vector<8x8xi32>
    %c0_i32_5 = arith.constant 0 : i32
    %11 = arith.cmpi slt, %4, %c0_i32_5 : i32
    %12 = vector.broadcast %11 : i1 to vector<8x8xi1>
    %13 = vector.broadcast %12 : vector<8x8xi1> to vector<8x8xi1>
    %14 = arith.xori %10, %13 : vector<8x8xi1>
    %15 = arith.andi %14, %8 : vector<8x8xi1>
    %16 = vector.broadcast %4 : i32 to vector<8x8xi32>
    %17 = arith.addi %6, %16 : vector<8x8xi32>
    %18 = arith.select %15, %17, %6 : vector<8x8xi1>, vector<8x8xi32>
    %c0_i32_6 = arith.constant 0 : i32
    %19 = vector.broadcast %c0_i32_6 : i32 to vector<8x8xi32>
    %20 = arith.cmpi eq, %18, %19 : vector<8x8xi32>
    %c0_7 = arith.constant 0 : index
    %c0_8 = arith.constant 0 : index
    %c0_9 = arith.constant 0 : index
    %c0_10 = arith.constant 0 : index
    %21 = vector.load %arg2[%c0_7, %c0_8, %c0_9, %c0_10] : memref<1x8x4x8xf32, #tpu.memory_space<vmem>>, vector<1x8x1x8xf32>
    %22 = vector.shape_cast %21 : vector<1x8x1x8xf32> to vector<8x8xf32>
    %23 = vector.extract_strided_slice %22 {offsets = [0, 1], sizes = [8, 7], strides = [1, 1]} : vector<8x8xf32> to vector<8x7xf32>
    %24 = vector.extract_strided_slice %22 {offsets = [0, 0], sizes = [8, 1], strides = [1, 1]} : vector<8x8xf32> to vector<8x1xf32>
    %25 = tpu.concatenate %23, %24 in 1 : vector<8x7xf32>, vector<8x1xf32> -> vector<8x8xf32>
    %26 = vector.extract_strided_slice %22 {offsets = [0, 7], sizes = [8, 1], strides = [1, 1]} : vector<8x8xf32> to vector<8x1xf32>
    %27 = vector.extract_strided_slice %22 {offsets = [0, 0], sizes = [8, 7], strides = [1, 1]} : vector<8x8xf32> to vector<8x7xf32>
    %28 = tpu.concatenate %26, %27 in 1 : vector<8x1xf32>, vector<8x7xf32> -> vector<8x8xf32>
    %cst = arith.constant 0.000000e+00 : f32
    %29 = vector.broadcast %cst : f32 to vector<8x8xf32>
    %30 = arith.subf %29, %25 : vector<8x8xf32>
    %31 = arith.select %20, %30, %28 : vector<8x8xi1>, vector<8x8xf32>
    %32 = arith.mulf %22, %0 : vector<8x8xf32>
    %33 = arith.mulf %31, %1 : vector<8x8xf32>
    %34 = arith.addf %32, %33 : vector<8x8xf32>
    %c0_11 = arith.constant 0 : index
    %c0_12 = arith.constant 0 : index
    %c0_13 = arith.constant 0 : index
    %c0_14 = arith.constant 0 : index
    %35 = vector.load %arg5[%c0_11, %c0_12, %c0_13, %c0_14] : memref<1x4x8x8xf32, #tpu.memory_space<vmem>>, vector<1x1x8x8xf32>
    %36 = vector.shape_cast %35 : vector<1x1x8x8xf32> to vector<8x8xf32>
    %37 = vector.shape_cast %34 : vector<8x8xf32> to vector<1x1x8x8xf32>
    tpu.vector_store %arg5[%c0_11, %c0_12, %c0_13, %c0_14], %37 {strides = array<i32>} : memref<1x4x8x8xf32, #tpu.memory_space<vmem>>, vector<1x1x8x8xf32>,
    %c0_15 = arith.constant 0 : index
    %c0_16 = arith.constant 0 : index
    %c1 = arith.constant 1 : index
    %c0_17 = arith.constant 0 : index
    %38 = vector.load %arg2[%c0_15, %c0_16, %c1, %c0_17] : memref<1x8x4x8xf32, #tpu.memory_space<vmem>>, vector<1x8x1x8xf32>
    %39 = vector.shape_cast %38 : vector<1x8x1x8xf32> to vector<8x8xf32>
    %40 = vector.extract_strided_slice %39 {offsets = [0, 1], sizes = [8, 7], strides = [1, 1]} : vector<8x8xf32> to vector<8x7xf32>
    %41 = vector.extract_strided_slice %39 {offsets = [0, 0], sizes = [8, 1], strides = [1, 1]} : vector<8x8xf32> to vector<8x1xf32>
    %42 = tpu.concatenate %40, %41 in 1 : vector<8x7xf32>, vector<8x1xf32> -> vector<8x8xf32>
    %43 = vector.extract_strided_slice %39 {offsets = [0, 7], sizes = [8, 1], strides = [1, 1]} : vector<8x8xf32> to vector<8x1xf32>
    %44 = vector.extract_strided_slice %39 {offsets = [0, 0], sizes = [8, 7], strides = [1, 1]} : vector<8x8xf32> to vector<8x7xf32>
    %45 = tpu.concatenate %43, %44 in 1 : vector<8x1xf32>, vector<8x7xf32> -> vector<8x8xf32>
    %cst_18 = arith.constant 0.000000e+00 : f32
    %46 = vector.broadcast %cst_18 : f32 to vector<8x8xf32>
    %47 = arith.subf %46, %42 : vector<8x8xf32>
    %48 = arith.select %20, %47, %45 : vector<8x8xi1>, vector<8x8xf32>
    %49 = arith.mulf %39, %0 : vector<8x8xf32>
    %50 = arith.mulf %48, %1 : vector<8x8xf32>
    %51 = arith.addf %49, %50 : vector<8x8xf32>
    %c0_19 = arith.constant 0 : index
    %c1_20 = arith.constant 1 : index
    %c0_21 = arith.constant 0 : index
    %c0_22 = arith.constant 0 : index
    %52 = vector.load %arg5[%c0_19, %c1_20, %c0_21, %c0_22] : memref<1x4x8x8xf32, #tpu.memory_space<vmem>>, vector<1x1x8x8xf32>
    %53 = vector.shape_cast %52 : vector<1x1x8x8xf32> to vector<8x8xf32>
    %54 = vector.shape_cast %51 : vector<8x8xf32> to vector<1x1x8x8xf32>
    tpu.vector_store %arg5[%c0_19, %c1_20, %c0_21, %c0_22], %54 {strides = array<i32>} : memref<1x4x8x8xf32, #tpu.memory_space<vmem>>, vector<1x1x8x8xf32>,
    %c0_23 = arith.constant 0 : index
    %c0_24 = arith.constant 0 : index
    %c2 = arith.constant 2 : index
    %c0_25 = arith.constant 0 : index
    %55 = vector.load %arg2[%c0_23, %c0_24, %c2, %c0_25] : memref<1x8x4x8xf32, #tpu.memory_space<vmem>>, vector<1x8x1x8xf32>
    %56 = vector.shape_cast %55 : vector<1x8x1x8xf32> to vector<8x8xf32>
    %57 = vector.extract_strided_slice %56 {offsets = [0, 1], sizes = [8, 7], strides = [1, 1]} : vector<8x8xf32> to vector<8x7xf32>
    %58 = vector.extract_strided_slice %56 {offsets = [0, 0], sizes = [8, 1], strides = [1, 1]} : vector<8x8xf32> to vector<8x1xf32>
    %59 = tpu.concatenate %57, %58 in 1 : vector<8x7xf32>, vector<8x1xf32> -> vector<8x8xf32>
    %60 = vector.extract_strided_slice %56 {offsets = [0, 7], sizes = [8, 1], strides = [1, 1]} : vector<8x8xf32> to vector<8x1xf32>
    %61 = vector.extract_strided_slice %56 {offsets = [0, 0], sizes = [8, 7], strides = [1, 1]} : vector<8x8xf32> to vector<8x7xf32>
    %62 = tpu.concatenate %60, %61 in 1 : vector<8x1xf32>, vector<8x7xf32> -> vector<8x8xf32>
    %cst_26 = arith.constant 0.000000e+00 : f32
    %63 = vector.broadcast %cst_26 : f32 to vector<8x8xf32>
    %64 = arith.subf %63, %59 : vector<8x8xf32>
    %65 = arith.select %20, %64, %62 : vector<8x8xi1>, vector<8x8xf32>
    %66 = arith.mulf %56, %0 : vector<8x8xf32>
    %67 = arith.mulf %65, %1 : vector<8x8xf32>
    %68 = arith.addf %66, %67 : vector<8x8xf32>
    %c0_27 = arith.constant 0 : index
    %c2_28 = arith.constant 2 : index
    %c0_29 = arith.constant 0 : index
    %c0_30 = arith.constant 0 : index
    %69 = vector.load %arg5[%c0_27, %c2_28, %c0_29, %c0_30] : memref<1x4x8x8xf32, #tpu.memory_space<vmem>>, vector<1x1x8x8xf32>
    %70 = vector.shape_cast %69 : vector<1x1x8x8xf32> to vector<8x8xf32>
    %71 = vector.shape_cast %68 : vector<8x8xf32> to vector<1x1x8x8xf32>
    tpu.vector_store %arg5[%c0_27, %c2_28, %c0_29, %c0_30], %71 {strides = array<i32>} : memref<1x4x8x8xf32, #tpu.memory_space<vmem>>, vector<1x1x8x8xf32>,
    %c0_31 = arith.constant 0 : index
    %c0_32 = arith.constant 0 : index
    %c3 = arith.constant 3 : index
    %c0_33 = arith.constant 0 : index
    %72 = vector.load %arg2[%c0_31, %c0_32, %c3, %c0_33] : memref<1x8x4x8xf32, #tpu.memory_space<vmem>>, vector<1x8x1x8xf32>
    %73 = vector.shape_cast %72 : vector<1x8x1x8xf32> to vector<8x8xf32>
    %74 = vector.extract_strided_slice %73 {offsets = [0, 1], sizes = [8, 7], strides = [1, 1]} : vector<8x8xf32> to vector<8x7xf32>
    %75 = vector.extract_strided_slice %73 {offsets = [0, 0], sizes = [8, 1], strides = [1, 1]} : vector<8x8xf32> to vector<8x1xf32>
    %76 = tpu.concatenate %74, %75 in 1 : vector<8x7xf32>, vector<8x1xf32> -> vector<8x8xf32>
    %77 = vector.extract_strided_slice %73 {offsets = [0, 7], sizes = [8, 1], strides = [1, 1]} : vector<8x8xf32> to vector<8x1xf32>
    %78 = vector.extract_strided_slice %73 {offsets = [0, 0], sizes = [8, 7], strides = [1, 1]} : vector<8x8xf32> to vector<8x7xf32>
    %79 = tpu.concatenate %77, %78 in 1 : vector<8x1xf32>, vector<8x7xf32> -> vector<8x8xf32>
    %cst_34 = arith.constant 0.000000e+00 : f32
    %80 = vector.broadcast %cst_34 : f32 to vector<8x8xf32>
    %81 = arith.subf %80, %76 : vector<8x8xf32>
    %82 = arith.select %20, %81, %79 : vector<8x8xi1>, vector<8x8xf32>
    %83 = arith.mulf %73, %0 : vector<8x8xf32>
    %84 = arith.mulf %82, %1 : vector<8x8xf32>
    %85 = arith.addf %83, %84 : vector<8x8xf32>
    %c0_35 = arith.constant 0 : index
    %c3_36 = arith.constant 3 : index
    %c0_37 = arith.constant 0 : index
    %c0_38 = arith.constant 0 : index
    %86 = vector.load %arg5[%c0_35, %c3_36, %c0_37, %c0_38] : memref<1x4x8x8xf32, #tpu.memory_space<vmem>>, vector<1x1x8x8xf32>
    %87 = vector.shape_cast %86 : vector<1x1x8x8xf32> to vector<8x8xf32>
    %88 = vector.shape_cast %85 : vector<8x8xf32> to vector<1x1x8x8xf32>
    tpu.vector_store %arg5[%c0_35, %c3_36, %c0_37, %c0_38], %88 {strides = array<i32>} : memref<1x4x8x8xf32, #tpu.memory_space<vmem>>, vector<1x1x8x8xf32>,
    return
  }
  func.func @transform_0(%arg0: i32, %arg1: i32) -> (i32, i32, i32, i32) {
    %c0_i32 = arith.constant 0 : i32
    %c0_i32_0 = arith.constant 0 : i32
    %c0_i32_1 = arith.constant 0 : i32
    return %arg1, %arg0, %c0_i32, %c0_i32_0 : i32, i32, i32, i32
  }
  func.func @transform_1(%arg0: i32, %arg1: i32) -> (i32, i32) {
    %c0_i32 = arith.constant 0 : i32
    %c0_i32_0 = arith.constant 0 : i32
    return %arg0, %c0_i32 : i32, i32
  }
  func.func @transform_2(%arg0: i32, %arg1: i32) -> (i32, i32) {
    %c0_i32 = arith.constant 0 : i32
    %c0_i32_0 = arith.constant 0 : i32
    return %arg0, %c0_i32 : i32, i32
  }
  func.func @transform_3(%arg0: i32, %arg1: i32) -> (i32, i32, i32, i32) {
    %c0_i32 = arith.constant 0 : i32
    %c0_i32_0 = arith.constant 0 : i32
    %c0_i32_1 = arith.constant 0 : i32
    return %arg1, %c0_i32, %arg0, %c0_i32_0 : i32, i32, i32, i32
  }
}

</mosaic_0001>

<bundles_post_ra>
// kernel: tpu_custom_call.1
= control target key start
LH: loop header
LB: loop body
LE: loop exit
PB: predicated region body
PF: predicated region fallthrough
CT: control target
= control target key end

     0   :  { %8 = vsyncpa [#allocation3], 0  ;;  %s1478_s0 = inlined_call_operand.vmem [shape: f32[2,8,4,8], index: 0, kind: input, shape index: {}]   ;;  %s1479_s1 = inlined_call_operand.vmem [shape: f32[512,8], index: 1, kind: input, shape index: {}]   ;;  %s1480_s2 = inlined_call_operand.vmem [shape: f32[512,8], index: 2, kind: input, shape index: {}]   ;;  %s1481_s3 = inlined_call_operand.hbm [shape: f32[2,4,8,8], index: 3, kind: output, shape index: {}]  }
   0x1   :  { %10 = vsyncpa [#allocation3 + $0x1], 0  ;;  %s1002_s12 = smov 0   ;;  %s1004_s13 = smov 0  }
   0x2   :  { %s1006_s14 = smov 0   ;;  %s1008_s15 = smov 0  }
   0x3   :  { %s1010_s16 = smov 0   ;;  %s1012_s17 = smov 0  }
   0x4 LB: > { %s814_s18 = sadd.s32 4294967295, %s973_s17   ;;  %s815_s19 = sadd.s32 4294967294, %s973_s17   ;;  %s973_s17 = sphi %s1012_s17, %s16_s17   ;;  %s969_s16 = sphi %s1010_s16, %s1490_s16   ;;  %s965_s15 = sphi %s1008_s15, %s1489_s15   ;;  %s961_s14 = sphi %s1006_s14, %s1488_s14   ;;  %s957_s13 = sphi %s1004_s13, %s1487_s13   ;;  %s953_s12 = sphi %s1002_s12, %s1486_s12  }
   0x5   : > { %s25_s20 = sadd.s32 1, %s969_s16  ;;  %s117_s21 = sadd.s32 1, %s961_s14 }
   0x6   : > { %p26_p0 = scmp.ge.s32.totalorder %s25_s20, 2  ;;  %p127_p1 = scmp.ne.s32.totalorder %s961_s14, %s957_s13 }
   0x7   : > { %p128_p2 = scmp.eq.s32.totalorder %s814_s18, 1  ;;  %p133_p3 = scmp.ne.s32.totalorder %s957_s13, %s953_s12 }
   0x8   : > { %s1492_s20 = smov (%p26_p0, %s25_s20), 0  ;;  %p134_p5 = scmp.eq.s32.totalorder %s815_s19, 1 }
   0x9   : > { %p1042_p4 = por %p128_p2, %p127_p1  ;;  %s112_s23 = ssub.s32 %s969_s16, %s1492_s20 }
   0xa   : > { %p820_p6 = scmp.ge.s32.totalorder %s973_s17, 1  ;;  %p115_p7 = scmp.eq.s32.totalorder %s112_s23, 0 }
   0xb   : > { %p1049_p8 = por %p134_p5, %p133_p3  ;;  %p179_p9 = scmp.lt.s32.totalorder %s973_s17, 3 }
   0xc   : > { %s1055_s25 = scalar_select %p115_p7, %s961_s14, %s117_s21  }
   0xd   : > { %p180_p10 = pnand %p820_p6, %p179_p9 }
   0xe   : > { %p216_p11 = scmp.lt.s32.totalorder (!%p180_p10), %s965_s15, 1  ;;  %vm267_vm0 = vcmask (!%p180_p10), 1041409   ;;  %vm270_vm1 = vcmask (!%p180_p10), 1042434   ;;  %vm273_vm2 = vcmask (!%p180_p10), 1043459   ;;  %vm276_vm3 = vcmask (!%p180_p10), 1044484   ;;  %s975_s4 = smov (!%p180_p10), 127  }
   0xf   : > { %183 = sbr.rel (%p180_p10) target bundleno = 225 (0xe1), region = 32  ;;  %vm279_vm4 = vcmask (!%p180_p10), 1045509   ;;  %vm282_vm5 = vcmask (!%p180_p10), 1046534   ;;  %vm285_vm6 = vcmask (!%p180_p10), 1047559   ;;  %s976_s5 = smov (!%p180_p10), 7   ;;  %vm293_vm7 = vcmask (!%p180_p10), 56320  }
  0x10   : > { %s977_s6 = smov (!%p180_p10), 1   ;;  %s978_s7 = smov (!%p180_p10), 121   ;;  %vm301_vm8 = vcmask (!%p180_p10), 7168   ;;  %vm377_vm10 = vcmask (!%p180_p10), 64512  }
  0x11   : > { %s212_s18 = sand.u32 (!%p180_p10), 1, %s957_s13   ;;  %s833_s23 = sshll.u32 (!%p180_p10), %s965_s15, 9 }
  0x12   : > { %s821_s19 = sshll.u32 (!%p180_p10), %s212_s18, 5  ;;  %s1422_s29 = scalar_lea.hbm (!%p180_p10), %s1481_s3, %s833_s23 }
  0x13   : > { %s1369_s21 = scalar_lea.vmem (!%p180_p10), [#allocation2], %s821_s19 }
  0x16   : > { %s217_s26 = scalar_select %p216_p11, %s965_s15, 1 }
  0x17   : > { %s1432_s15 = scalar_lea.sflag [#allocation3], %s212_s18 }
  0x18   : > { %s832_s27 = sshll.u32 %s217_s26, 5  ;;  %s706_s26 = sshll.u32 %s1369_s21, 4  ;;  %s1424_s26 = int_to_ptr.vmem [resolvable:$true] %s706_s26 }
  0x19   : > { %s1062_s30 = scalar_lea.vmem %s1478_s0, %s832_s27 }
  0x1a   : > { %v1065_v0 = vld [vmem:[%s1062_s30 + $0x1] sm:$0x1]  ;;  %v1068_v1 = vld [vmem:[%s1062_s30 + $0x5] sm:$0x1]  ;;  %v1071_v2 = vld [vmem:[%s1062_s30 + $0x9] sm:$0x1] }
  0x1b   : > { %v1074_v3 = vld [vmem:[%s1062_s30 + $0xd] sm:$0x1]  ;;  %v1077_v4 = vld [vmem:[%s1062_s30 + $0x11] sm:$0x1]  ;;  %v1080_v5 = vld [vmem:[%s1062_s30 + $0x15] sm:$0x1] }
  0x1c   : > { %v1083_v6 = vld [vmem:[%s1062_s30 + $0x19] sm:$0x1]  ;;  %v395_v7 = vrot.slane %v1068_v1, 7  ;;  %v397_v8 = vrot.slane %v1071_v2, 6  ;;  %v1088_v9 = vld [vmem:[%s1062_s30 + $0x1d] sm:$0x1] }
  0x1d   : > { %v399_v10 = vrot.slane %v1074_v3, 5  ;;  %v401_v11 = vrot.slane %v1077_v4, 4  ;;  %v403_v12 = vrot.slane %v1080_v5, 3  ;;  %v405_v13 = vrot.slane %v1083_v6, 2  ;;  %v1097_v15 = vld [vmem:[%s1062_s30] sm:$0x1] }
  0x1e   : > { %v396_v14 = vsel %vm267_vm0, %v395_v7, %v1065_v0  ;;  %v1100_v16 = vld [vmem:[%s1062_s30 + $0x4] sm:$0x1]  ;;  %v1103_v17 = vld [vmem:[%s1062_s30 + $0x8] sm:$0x1]  ;;  %v1107_v19 = vld [vmem:[%s1062_s30 + $0xc] sm:$0x1] }
  0x1f   : > { %v398_v18 = vsel %vm270_vm1, %v397_v8, %v396_v14  ;;  %v1110_v20 = vld [vmem:[%s1062_s30 + $0x10] sm:$0x1]  ;;  %v1113_v21 = vld [vmem:[%s1062_s30 + $0x14] sm:$0x1]  ;;  %v407_v23 = vrot.slane %v1088_v9, 1  ;;  %v266_v25 = vrot.slane %v1100_v16, 7 }
  0x20   : > { %v400_v22 = vsel %vm273_vm2, %v399_v10, %v398_v18  ;;  %v1118_v24 = vld [vmem:[%s1062_s30 + $0x18] sm:$0x1]  ;;  %v269_v26 = vrot.slane %v1103_v17, 6  ;;  %v1124_v28 = vld [vmem:[%s1062_s30 + $0x1c] sm:$0x1]  ;;  %v272_v29 = vrot.slane %v1107_v19, 5 }
  0x21   : > { %v402_v27 = vsel %vm276_vm3, %v401_v11, %v400_v22  ;;  %v275_v30 = vrot.slane %v1110_v20, 4  ;;  %v268_v32 = vsel %vm267_vm0, %v266_v25, %v1097_v15  ;;  %v278_v33 = vrot.slane %v1113_v21, 3  ;;  %v1133_v34 = vld [vmem:[%s1062_s30 + $0x6] sm:$0x1]  ;;  %v1136_v35 = vld [vmem:[%s1062_s30 + $0xa] sm:$0x1] }
  0x22   : > { %v404_v31 = vsel %vm279_vm4, %v403_v12, %v402_v27  ;;  %v271_v37 = vsel %vm270_vm1, %v269_v26, %v268_v32  ;;  %v281_v38 = vrot.slane %v1118_v24, 2  ;;  %v1142_v39 = vld [vmem:[%s1062_s30 + $0xe] sm:$0x1]  ;;  %v1145_v40 = vld [vmem:[%s1062_s30 + $0x12] sm:$0x1]  ;;  %v284_v43 = vrot.slane %v1124_v28, 1 }
  0x23   : > { %v406_v36 = vsel %vm282_vm5, %v405_v13, %v404_v31  ;;  %v274_v42 = vsel %vm273_vm2, %v272_v29, %v271_v37  ;;  %v1151_v44 = vld [vmem:[%s1062_s30 + $0x2] sm:$0x1]  ;;  %v1154_v45 = vld [vmem:[%s1062_s30 + $0x16] sm:$0x1]  ;;  %v1159_v47 = vld [vmem:[%s1062_s30 + $0x1a] sm:$0x1] }
  0x24   : > { %v408_v41 = vsel %vm285_vm6, %v407_v23, %v406_v36  ;;  %v277_v46 = vsel %vm276_vm3, %v275_v30, %v274_v42  ;;  %v499_v48 = vrot.slane %v1133_v34, 7  ;;  %v501_v49 = vrot.slane %v1136_v35, 6  ;;  %v1165_v51 = vld [vmem:[%s1062_s30 + $0x1e] sm:$0x1]  ;;  %v1170_v54 = vld [vmem:[%s1062_s30 + $0x7] sm:$0x1] }
  0x25   : > { %409 = vrot.lane.b32.xlu1 %v408_v41, %s975_s4  ;;  %v280_v50 = vsel %vm279_vm4, %v278_v33, %v277_v46  ;;  %v503_v52 = vrot.slane %v1142_v39, 5  ;;  %v505_v53 = vrot.slane %v1145_v40, 4  ;;  %v507_v57 = vrot.slane %v1154_v45, 3  ;;  %v1177_v58 = vld [vmem:[%s1062_s30 + $0x3] sm:$0x1] }
  0x26   : > { %v283_v55 = vsel %vm282_vm5, %v281_v38, %v280_v50  ;;  %v500_v56 = vsel %vm267_vm0, %v499_v48, %v1151_v44  ;;  %v509_v61 = vrot.slane %v1159_v47, 2  ;;  %v1183_v62 = vld [vmem:[%s1062_s30 + $0xb] sm:$0x1]  ;;  %v1186_v63 = vld [vmem:[%s1062_s30 + $0xf] sm:$0x1]  ;;  %v511_v8 = vrot.slane %v1165_v51, 1 }
  0x27   : > { %v286_v59 = vsel %vm285_vm6, %v284_v43, %v283_v55  ;;  %v502_v60 = vsel %vm270_vm1, %v501_v49, %v500_v56  ;;  %v1192_v10 = vld [vmem:[%s1062_s30 + $0x13] sm:$0x1]  ;;  %v1195_v11 = vld [vmem:[%s1062_s30 + $0x17] sm:$0x1]  ;;  %v603_v12 = vrot.slane %v1170_v54, 7  ;;  %v605_v25 = vrot.slane %v1183_v62, 6 }
  0x28   : > { %287 = vrot.lane.b32.xlu0 %v286_v59, %s975_s4  ;;  %v504_v7 = vsel %vm273_vm2, %v503_v52, %v502_v60  ;;  %v1200_v14 = vld [vmem:[%s1062_s30 + $0x1b] sm:$0x1]  ;;  %v1204_v22 = vld [vmem:[%s1062_s30 + $0x1f] sm:$0x1]  ;;  %v607_v27 = vrot.slane %v1186_v63, 5  ;;  %v609_v29 = vrot.slane %v1192_v10, 4  ;;  %v235_v52 = vlaneseq }
  0x29   : > { %412 = vrot.lane.b32.xlu1 %v408_v41, %s976_s5  ;;  %v506_v13 = vsel %vm276_vm3, %v505_v53, %v504_v7  ;;  %v604_v23 = vsel %vm267_vm0, %v603_v12, %v1177_v58  ;;  %v611_v30 = vrot.slane %v1195_v11, 3  ;;  %v613_v33 = vrot.slane %v1200_v14, 2  ;;  %v233_v53 = vld [vmem:[%s1479_s1] sm:$0xff]  ;;  %s895_s30 = scalar_lea.vmem %s1424_s26, 512 }
  0x2a   : > { %v508_v18 = vsel %vm279_vm4, %v507_v57, %v506_v13  ;;  %v606_v32 = vsel %vm270_vm1, %v605_v25, %v604_v23  ;;  %v615_v37 = vrot.slane %v1204_v22, 1  ;;  %v306_v57 = vrot.slane %v233_v53, 1  ;;  %p896_p12 = scmp.ne.s32.totalorder %s1424_s26, %s895_s30 }
  0x2b   : > { %v510_v26 = vsel %vm282_vm5, %v509_v61, %v508_v18  ;;  %v608_v36 = vsel %vm273_vm2, %v607_v27, %v606_v32  ;;  %v236_v60 = vand.u32 127, %v235_v52  ;;  %v307_v61 = vrot.slane %v233_v53, 2 }
  0x2c   : > { %290 = vrot.lane.b32.xlu0 %v286_v59, %s976_s5  ;;  %v512_v31 = vsel %vm285_vm6, %v511_v8, %v510_v26  ;;  %v610_v38 = vsel %vm276_vm3, %v609_v29, %v608_v36  ;;  %v309_v7 = vrot.slane %v233_v53, 4  ;;  %v311_v12 = vrot.slane %v233_v53, 6  ;;  %p897_p13 = pnand %p896_p12, %p1042_p4 }
  0x2d   : > { %516 = vrot.lane.b32.xlu1 %v512_v31, %s976_s5  ;;  %v612_v42 = vsel %vm279_vm4, %v611_v30, %v610_v38  ;;  %v312_v13 = vrot.slane %v233_v53, 7  ;;  %v1228_v18 = vmul.f32 %v1065_v0, %v233_v53  ;;  %v1231_v23 = vmul.f32 %v1068_v1, %v306_v57 }
  0x2e   : > { %v614_v43 = vsel %vm282_vm5, %v613_v33, %v612_v42  ;;  %v1234_v25 = vmul.f32 %v1071_v2, %v307_v61  ;;  %v1240_v27 = vmul.f32 %v1077_v4, %v309_v7  ;;  %v1246_v0 = vmul.f32 %v1083_v6, %v311_v12  ;;  %p898_p0 = pneg %p897_p13 }
  0x2f   : > { %v616_v46 = vsel %vm285_vm6, %v615_v37, %v614_v43  ;;  %v1249_v1 = vmul.f32 %v1088_v9, %v312_v13  ;;  %v321_v2 = vmul.f32 %v1097_v15, %v233_v53  ;;  %v323_v32 = vmul.f32 %v307_v61, %v1103_v17 }
  0x30   : > { %513 = vrot.lane.b32.xlu0 %v512_v31, %s975_s4  ;;  %v325_v36 = vmul.f32 %v309_v7, %v1110_v20  ;;  %v327_v6 = vmul.f32 %v311_v12, %v1118_v24  ;;  %v328_v9 = vmul.f32 %v312_v13, %v1124_v28  ;;  %v1261_v38 = vmul.f32 %v1151_v44, %v233_v53 }
  0x31   : > { %620 = vrot.lane.b32.xlu1 %v616_v46, %s976_s5  ;;  %v1264_v15 = vmul.f32 %v1133_v34, %v306_v57  ;;  %v1267_v17 = vmul.f32 %v1136_v35, %v307_v61  ;;  %v1273_v20 = vmul.f32 %v1145_v40, %v309_v7  ;;  %v1283_v28 = vmul.f32 %v1159_v47, %v311_v12 }
  0x32   : > { %v1286_v34 = vmul.f32 %v1165_v51, %v312_v13  ;;  %v1294_v44 = vmul.f32 %v1177_v58, %v233_v53  ;;  %v1300_v43 = vmul.f32 %v1170_v54, %v306_v57  ;;  %v1303_v51 = vmul.f32 %v1183_v62, %v307_v61 }
  0x33   : > { %v1319_v62 = vmul.f32 %v1200_v14, %v311_v12 }
  0x34   : > { %617 = vrot.lane.b32.xlu0 %v616_v46, %s975_s4  ;;  %s979_s4 = smov [#allocation2]  }
  0x35   : > { %298 = vrot.lane.b32.xlu1 %v286_v59, %s977_s6  ;;  %s899_s5 = sshll.u32 %s979_s4, 4  ;;  %s900_s5 = int_to_ptr.vmem [resolvable:$false] %s899_s5 }
  0x36   : > { %p902_p1 = scmp.lt.s32.totalorder %s1424_s26, %s900_s5 }
  0x38   : > { %295 = vrot.lane.b32.xlu0 %v286_v59, %s978_s7  ;;  %v308_v59 = vrot.slane %v233_v53, 3 }
  0x39   : > { %419 = vrot.lane.b32.xlu1 %v408_v41, %s977_s6 }
  0x3a   : > { %v1237_v26 = vmul.f32 %v1074_v3, %v308_v59  ;;  %v322_v3 = vmul.f32 %v306_v57, %v1100_v16  ;;  %v324_v4 = vmul.f32 %v308_v59, %v1107_v19  ;;  %v1270_v19 = vmul.f32 %v1142_v39, %v308_v59  ;;  %v1291_v39 = vld [vmem:[%s1480_s2] sm:$0xff] }
  0x3b   : > { %v1309_v58 = vmul.f32 %v1186_v63, %v308_v59 }
  0x3c   : > { %416 = vrot.lane.b32.xlu0 %v408_v41, %s978_s7  ;;  %v310_v41 = vrot.slane %v233_v53, 5  ;;  %v1322_v53 = vmul.f32 %v1204_v22, %v312_v13 }
  0x3d   : > { %523 = vrot.lane.b32.xlu1 %v512_v31, %s977_s6 }
  0x3e   : > { %v1243_v30 = vmul.f32 %v1080_v5, %v310_v41  ;;  %v326_v5 = vmul.f32 %v310_v41, %v1113_v21  ;;  %v1280_v24 = vmul.f32 %v1154_v45, %v310_v41 }
  0x40   : > { %520 = vrot.lane.b32.xlu0 %v512_v31, %s978_s7  ;;  %v241_v31 = vand.u32 1, %v236_v60 }
  0x41   : > { %627 = vrot.lane.b32.xlu1 %v616_v46, %s977_s6  ;;  %s901_s6 = scalar_lea.vmem %s900_s5, 1024 }
  0x42   : > { %vm1275_vm9 = vcmp.eq.s32.totalorder %v241_v31, 0  ;;  %p903_p2 = scmp.lt.s32.totalorder %s901_s6, %s895_s30 }
  0x44   : > { %624 = vrot.lane.b32.xlu0 %v616_v46, %s978_s7  ;;  %p904_p3 = por %p903_p2, %p902_p1 }
  0x46   : > { %p905_p5 = pnand %p904_p3, %p898_p0 }
  0x97   : > { %v410_v48 = vpop.permute.xlu1 %409 }
  0x9a   : > { %v288_v49 = vpop.permute.xlu0 %287 }
  0x9b   : > { %v413_v50 = vpop.permute.xlu1 %412 }
  0x9c   : > { %v415_v42 = vsel %vm293_vm7, %v410_v48, %v413_v50  ;;  %v1312_v48 = vmul.f32 %v1192_v10, %v309_v7  ;;  %v1315_v50 = vmul.f32 %v1195_v11, %v310_v41 }
  0x9e   : > { %v291_v55 = vpop.permute.xlu0 %290 }
  0x9f   : > { %v517_v56 = vpop.permute.xlu1 %516  ;;  %v294_v37 = vsel %vm293_vm7, %v288_v49, %v291_v55  ;;  %v423_v55 = vsub.f32 0.0, %v415_v42 }
  0xa0   : > { %v303_v35 = vsub.f32 0.0, %v294_v37 }
  0xa2   : > { %v514_v8 = vpop.permute.xlu0 %513 }
  0xa3   : > { %v621_v29 = vpop.permute.xlu1 %620  ;;  %v519_v45 = vsel %vm293_vm7, %v514_v8, %v517_v56 }
  0xa4   : > { %v527_v56 = vsub.f32 0.0, %v519_v45 }
  0xa6   : > { %v618_v33 = vpop.permute.xlu0 %617 }
  0xa7   : > { %v299_v16 = vpop.permute.xlu1 %298  ;;  %v623_v46 = vsel %vm293_vm7, %v618_v33, %v621_v29 }
  0xa8   : > { %v631_v60 = vsub.f32 0.0, %v623_v46 }
  0xaa   : > { %v296_v40 = vpop.permute.xlu0 %295 }
  0xab   : > { %v302_v47 = vsel %vm301_vm8, %v296_v40, %v299_v16  ;;  %v420_v52 = vpop.permute.xlu1 %419 }
  0xac   : > { %v304_v49 = vsel %vm1275_vm9, %v303_v35, %v302_v47 }
  0xad   : > { %v329_v54 = vmul.f32 %v304_v49, %v1291_v39 }
  0xae   : > { %v417_v57 = vpop.permute.xlu0 %416 }
  0xaf   : > { %v331_v63 = vrot.slane %v329_v54, 1  ;;  %v332_v61 = vrot.slane %v329_v54, 2  ;;  %v333_v59 = vrot.slane %v329_v54, 3  ;;  %v422_v10 = vsel %vm301_vm8, %v417_v57, %v420_v52  ;;  %v524_v7 = vpop.permute.xlu1 %523 }
  0xb0   : > { %v334_v11 = vrot.slane %v329_v54, 4  ;;  %v335_v41 = vrot.slane %v329_v54, 5  ;;  %v336_v8 = vrot.slane %v329_v54, 6  ;;  %v424_v14 = vsel %vm1275_vm9, %v423_v55, %v422_v10 }
  0xb1   : > { %v347_v29 = vadd.f32 %v331_v63, %v322_v3  ;;  %v337_v12 = vrot.slane %v329_v54, 7  ;;  %v348_v22 = vadd.f32 %v332_v61, %v323_v32  ;;  %v346_v13 = vadd.f32 %v329_v54, %v321_v2 }
  0xb2   : > { %v433_v31 = vmul.f32 %v424_v14, %v1291_v39  ;;  %v521_v33 = vpop.permute.xlu0 %520  ;;  %v349_v37 = vadd.f32 %v333_v59, %v324_v4  ;;  %v350_v16 = vadd.f32 %v334_v11, %v325_v36  ;;  %v351_v42 = vadd.f32 %v335_v41, %v326_v5 }
  0xb3   : > { %v362_v35 = vrot.slane %v347_v29, 7  ;;  %v526_v40 = vsel %vm301_vm8, %v521_v33, %v524_v7  ;;  %v352_v45 = vadd.f32 %v336_v8, %v327_v6  ;;  %v628_v49 = vpop.permute.xlu1 %627  ;;  %v353_v52 = vadd.f32 %v337_v12, %v328_v9 }
  0xb4   : > { %v435_v47 = vrot.slane %v433_v31, 1  ;;  %v436_v46 = vrot.slane %v433_v31, 2  ;;  %v437_v3 = vrot.slane %v433_v31, 3  ;;  %v450_v32 = vadd.f32 %v433_v31, %v1228_v18 }
  0xb5   : > { %v528_v2 = vsel %vm1275_vm9, %v527_v56, %v526_v40  ;;  %v363_v4 = vsel %vm267_vm0, %v362_v35, %v346_v13  ;;  %v364_v36 = vrot.slane %v348_v22, 6  ;;  %v366_v55 = vrot.slane %v349_v37, 5 }
  0xb6   : > { %v451_v54 = vadd.f32 %v435_v47, %v1231_v23  ;;  %v1335_v5 = vmul.f32 %v528_v2, %v1291_v39  ;;  %v625_v6 = vpop.permute.xlu0 %624  ;;  %v368_v57 = vrot.slane %v350_v16, 4  ;;  %v370_v63 = vrot.slane %v351_v42, 3 }
  0xb7   : > { %v630_v9 = vsel %vm301_vm8, %v625_v6, %v628_v49  ;;  %v365_v18 = vsel %vm270_vm1, %v364_v36, %v363_v4  ;;  %v372_v61 = vrot.slane %v352_v45, 2  ;;  %v374_v23 = vrot.slane %v353_v52, 1 }
  0xb8   : > { %v466_v56 = vrot.slane %v451_v54, 7  ;;  %v539_v59 = vrot.slane %v1335_v5, 1  ;;  %v540_v10 = vrot.slane %v1335_v5, 2  ;;  %v541_v7 = vrot.slane %v1335_v5, 3 }
  0xb9   : > { %v632_v11 = vsel %vm1275_vm9, %v631_v60, %v630_v9  ;;  %v367_v41 = vsel %vm273_vm2, %v366_v55, %v365_v18  ;;  %v438_v8 = vrot.slane %v433_v31, 4  ;;  %v439_v22 = vrot.slane %v433_v31, 5 }
  0xba   : > { %v555_v29 = vadd.f32 %v539_v59, %v1264_v15  ;;  %v1350_v14 = vmul.f32 %v632_v11, %v1291_v39  ;;  %v369_v12 = vsel %vm276_vm3, %v368_v57, %v367_v41  ;;  %v440_v33 = vrot.slane %v433_v31, 6 }
  0xbb   : > { %v371_v13 = vsel %vm279_vm4, %v370_v63, %v369_v12  ;;  %v441_v37 = vrot.slane %v433_v31, 7  ;;  %v452_v21 = vadd.f32 %v436_v46, %v1234_v25  ;;  %v554_v60 = vadd.f32 %v1335_v5, %v1261_v38 }
  0xbc   : > { %v570_v16 = vrot.slane %v555_v29, 7  ;;  %v643_v35 = vrot.slane %v1350_v14, 1  ;;  %v644_v15 = vrot.slane %v1350_v14, 2  ;;  %v645_v39 = vrot.slane %v1350_v14, 3 }
  0xbd   : > { %v373_v40 = vsel %vm282_vm5, %v372_v61, %v371_v13  ;;  %v453_v42 = vadd.f32 %v437_v3, %v1237_v26  ;;  %v454_v45 = vadd.f32 %v438_v8, %v1240_v27  ;;  %v455_v47 = vadd.f32 %v439_v22, %v1243_v30 }
  0xbe   : > { %v659_v31 = vadd.f32 %v643_v35, %v1300_v43  ;;  %v375_v25 = vsel %vm285_vm6, %v374_v23, %v373_v40  ;;  %v456_v38 = vadd.f32 %v440_v33, %v1246_v0  ;;  %v658_v46 = vadd.f32 %v1350_v14, %v1294_v44 }
  0xbf   : > { %378 = vst.msk [vmem:[%s1369_s21] sm:$0xff] %vm377_vm10, %v375_v25  ;;  %v457_v26 = vadd.f32 %v441_v37, %v1249_v1  ;;  %v467_v27 = vsel %vm267_vm0, %v466_v56, %v450_v32  ;;  %v468_v3 = vrot.slane %v452_v21, 6  ;;  %v470_v49 = vrot.slane %v453_v42, 5 }
  0xc0   : > { %v674_v43 = vrot.slane %v659_v31, 7  ;;  %v472_v52 = vrot.slane %v454_v45, 4  ;;  %v474_v2 = vrot.slane %v455_v47, 3  ;;  %v476_v0 = vrot.slane %v456_v38, 2 }
  0xc1   : > { %v469_v30 = vsel %vm270_vm1, %v468_v3, %v467_v27  ;;  %v542_v4 = vrot.slane %v1335_v5, 4  ;;  %v543_v44 = vrot.slane %v1335_v5, 5  ;;  %v544_v54 = vrot.slane %v1335_v5, 6 }
  0xc2   : > { %v471_v36 = vsel %vm273_vm2, %v470_v49, %v469_v30  ;;  %v545_v1 = vrot.slane %v1335_v5, 7  ;;  %v556_v32 = vadd.f32 %v540_v10, %v1267_v17  ;;  %v557_v55 = vadd.f32 %v541_v7, %v1270_v19 }
  0xc3   : > { %v473_v6 = vsel %vm276_vm3, %v472_v52, %v471_v36  ;;  %v558_v57 = vadd.f32 %v542_v4, %v1273_v20  ;;  %v559_v9 = vadd.f32 %v543_v44, %v1280_v24  ;;  %v478_v63 = vrot.slane %v457_v26, 1 }
  0xc4   : > { %v475_v18 = vsel %vm279_vm4, %v474_v2, %v473_v6  ;;  %v560_v61 = vadd.f32 %v544_v54, %v1283_v28  ;;  %v571_v56 = vsel %vm267_vm0, %v570_v16, %v554_v60  ;;  %v561_v17 = vadd.f32 %v545_v1, %v1286_v34 }
  0xc5   : > { %v477_v5 = vsel %vm282_vm5, %v476_v0, %v475_v18  ;;  %v572_v59 = vrot.slane %v556_v32, 6  ;;  %v574_v10 = vrot.slane %v557_v55, 5  ;;  %v576_v19 = vrot.slane %v558_v57, 4 }
  0xc6   : > { %v479_v23 = vsel %vm285_vm6, %v478_v63, %v477_v5  ;;  %v578_v7 = vrot.slane %v559_v9, 3  ;;  %v580_v20 = vrot.slane %v560_v61, 2  ;;  %v646_v11 = vrot.slane %v1350_v14, 4 }
  0xc7   : > { %824 = vst.msk [vmem:[%s1369_s21 + $0x8] sm:$0xff] %vm377_vm10, %v479_v23  ;;  %v573_v24 = vsel %vm270_vm1, %v572_v59, %v571_v56  ;;  %v647_v28 = vrot.slane %v1350_v14, 5  ;;  %v648_v41 = vrot.slane %v1350_v14, 6  ;;  %v649_v34 = vrot.slane %v1350_v14, 7 }
  0xc8   : > { %v575_v8 = vsel %vm273_vm2, %v574_v10, %v573_v24  ;;  %v660_v29 = vadd.f32 %v644_v15, %v1303_v51  ;;  %v661_v12 = vadd.f32 %v645_v39, %v1309_v58  ;;  %v582_v13 = vrot.slane %v561_v17, 1 }
  0xc9   : > { %v577_v22 = vsel %vm276_vm3, %v576_v19, %v575_v8  ;;  %v662_v33 = vadd.f32 %v646_v11, %v1312_v48  ;;  %v663_v37 = vadd.f32 %v647_v28, %v1315_v50  ;;  %v664_v60 = vadd.f32 %v648_v41, %v1319_v62 }
  0xca   : > { %v579_v21 = vsel %vm279_vm4, %v578_v7, %v577_v22  ;;  %v675_v14 = vsel %vm267_vm0, %v674_v43, %v658_v46  ;;  %v676_v16 = vrot.slane %v660_v29, 6  ;;  %v665_v58 = vadd.f32 %v649_v34, %v1322_v53 }
  0xcb   : > { %v581_v51 = vsel %vm282_vm5, %v580_v20, %v579_v21  ;;  %v678_v35 = vrot.slane %v661_v12, 5  ;;  %v680_v48 = vrot.slane %v662_v33, 4  ;;  %v682_v62 = vrot.slane %v663_v37, 3 }
  0xcc   : > { %v583_v15 = vsel %vm285_vm6, %v582_v13, %v581_v51  ;;  %v677_v39 = vsel %vm270_vm1, %v676_v16, %v675_v14  ;;  %v684_v42 = vrot.slane %v664_v60, 2  ;;  %v686_v45 = vrot.slane %v665_v58, 1 }
  0xcd   : > { %825 = vst.msk [vmem:[%s1369_s21 + $0x10] sm:$0xff] %vm377_vm10, %v583_v15  ;;  %v679_v50 = vsel %vm273_vm2, %v678_v35, %v677_v39 }
  0xce   : > { %v681_v40 = vsel %vm276_vm3, %v680_v48, %v679_v50 }
  0xcf   : > { %v683_v53 = vsel %vm279_vm4, %v682_v62, %v681_v40 }
  0xd0   : > { %v685_v31 = vsel %vm282_vm5, %v684_v42, %v683_v53 }
  0xd1   : > { %v687_v25 = vsel %vm285_vm6, %v686_v45, %v685_v31 }
  0xd2   : > { %826 = vst.msk [vmem:[%s1369_s21 + $0x18] sm:$0xff] %vm377_vm10, %v687_v25 }
  0xd3   : > { %908 = shalt.err (!%p905_p5)
}
  0xd4   : > { %s909_s7 = scalar_lea.hbm %s1422_s29, 512  ;;  %s913_s10 = scalar_lea.hbm %s1481_s3, 1024 }
  0xd5   : > { %p910_p6 = scmp.ne.s32.totalorder %s1422_s29, %s909_s7  ;;  %p914_p10 = scmp.lt.u32.totalorder %s1422_s29, %s1481_s3 }
  0xd6   : > { %p915_p11 = scmp.lt.u32.totalorder %s913_s10, %s909_s7  ;;  %p917_p13 = scmp.lt.u32.totalorder %s909_s7, %s1422_s29 }
  0xd7   : > { %p911_p7 = pnand %p910_p6, %p1042_p4 }
  0xd8   : > { %p916_p12 = por %p915_p11, %p914_p10 }
  0xd9   : > { %p912_p9 = pneg %p911_p7 }
  0xda   : > { %p918_p0 = por %p917_p13, %p916_p12 }
  0xdc   : > { %p919_p1 = pnand %p918_p0, %p912_p9 }
  0xde   : > { %922 = shalt.err (!%p919_p1)
}
  0xdf   : > { %s980_s19 = smov 128   ;;  %s981_s21 = smov 8  }
  0xe0   : > { %834 = dma.vmem_to_hbm [thread:$0]  (%p1042_p4), %s1424_s26, 512, %s1422_s29, %s1432_s15, %s980_s19, %s980_s19, %s981_s21  }
  0xe1 PF: > { %p840_p2 = scmp.ge.s32.totalorder %s973_s17, 2  ;;  %s721_s23 = sand.u32 1, %s953_s12  }
  0xe2   : > { %s722_s27 = scalar_lea.sflag [#allocation3], %s721_s23 }
  0xe3   : > { %p837_p3 = pnand %p840_p2, %p1049_p8 }
  0xe5   : > { %948 = dma.done.wait (!%p837_p3), %s722_s27, 512  }
  0xe6   : > { %950 = vsyncadd (!%p837_p3), %s722_s27, 4294966784  ;;  %s16_s17 = sadd.s32 1, %s973_s17   ;;  %s1486_s12 = smov %s957_s13 }
  0xe7   : > { %p13_p5 = scmp.ge.s32.totalorder %s16_s17, 4   ;;  %s1487_s13 = smov %s961_s14 }
  0xe8   : > { %s1488_s14 = smov %s1055_s25  ;;  %s1489_s15 = smov %s969_s16 }
  0xe9   : > { %s1490_s16 = smov %s1492_s20  ;;  %15 = sbr.rel (!%p13_p5) target bundleno = 4 (0x4), region = 76 }
  0xf0   :  { %727 = vsyncpa [#allocation3], 1 }
  0xf1   :  { %729 = vsyncpa [#allocation3 + $0x1], 1 }

</bundles_post_ra>
